<compile_context>
chip_gen: v6e
topology: v6e:2x2x1
jax: 0.10.0
libtpu: 0.0.40
codegen_flags: <defaults>
</compile_context>

<pallas_src>
import jax
import jax.numpy as jnp
from jax import lax
from jax.experimental import pallas as pl
from jax.experimental.pallas import tpu as pltpu


def _round_up(x, m):
    return ((x + m - 1) // m) * m


def _vmem_capacity_bytes():
    try:
        return int(pltpu.get_tpu_info().vmem_capacity_bytes)
    except Exception:
        return 64 * 1024 * 1024          # conservative: v7x per-TC VMEM


def _choose_row_tile(n, d, itemsize, per_tile_budget):
    """Row tile for one stream: whole stream if it fits in one block, else the
    largest sublane-aligned tile whose single buffer fits per_tile_budget."""
    if n <= 8:
        return n                          # block dims == full array dims
    rows = max(per_tile_budget // max(d * itemsize, 1), 8)
    rows = min(rows, 4096)
    if rows >= n:
        return _round_up(n, 8)            # one (possibly partial) block
    rows = (rows // 128) * 128 if rows >= 128 else (rows // 8) * 8
    return max(rows, 8)


def _make_coral_kernel(ns, nt, d, tn_s, tn_t, use_bf16):
    src_blocks = pl.cdiv(ns, tn_s)
    tgt_blocks = pl.cdiv(nt, tn_t)
    mask_src = (ns % tn_s) != 0
    mask_tgt = (nt % tn_t) != 0
    inv_8ns = 1.0 / (8.0 * float(ns))
    inv_8nt = 1.0 / (8.0 * float(nt))
    scale = 1.0 / (4.0 * float(d) ** 4)   # mean over d*d, then /(4*d*d)

    def kernel(s_ref, t_ref, out_ref, acc_ref, ssum_ref, tsum_ref):
        i = pl.program_id(0)

        @pl.when(i == 0)
        def _init():
            acc_ref[...] = jnp.zeros_like(acc_ref)
            ssum_ref[...] = jnp.zeros_like(ssum_ref)
            tsum_ref[...] = jnp.zeros_like(tsum_ref)
            out_ref[...] = jnp.zeros_like(out_ref)

        def _accumulate(x_ref, tile_rows, n_rows, needs_mask, sum_ref, subtract):
            x = x_ref[...]
            if needs_mask:
                # Partial last block: rows past n_rows are undefined -> zero them.
                row = i * tile_rows + lax.broadcasted_iota(jnp.int32, x.shape, 0)
                x = jnp.where(row < n_rows, x, jnp.zeros_like(x))
            x_f32 = x.astype(jnp.float32)
            x_mm = x.astype(jnp.bfloat16) if use_bf16 else x_f32
            gram = lax.dot_general(x_mm, x_mm, (((0,), (0,)), ((), ())),
                                   preferred_element_type=jnp.float32)
            if subtract:
                acc_ref[...] -= gram
            else:
                acc_ref[...] += gram
            # (1, d) column sum broadcast into all 8 sublane rows of the scratch
            # so the rank-1 correction below is a sublane-aligned K=8 matmul.
            sum_ref[...] += jnp.sum(x_f32, axis=0, keepdims=True)

        @pl.when(i < src_blocks)          # skip MXU/VPU work on padded steps
        def _source():
            _accumulate(s_ref, tn_s, ns, mask_src, ssum_ref, subtract=False)

        @pl.when(i < tgt_blocks)
        def _target():
            _accumulate(t_ref, tn_t, nt, mask_tgt, tsum_ref, subtract=True)

        @pl.when(i == pl.num_programs(0) - 1)
        def _finalize():
            s8 = ssum_ref[...]
            t8 = tsum_ref[...]
            corr_s = lax.dot_general(s8, s8, (((0,), (0,)), ((), ())),
                                     preferred_element_type=jnp.float32)
            corr_t = lax.dot_general(t8, t8, (((0,), (0,)), ((), ())),
                                     preferred_element_type=jnp.float32)
            # Every scratch row holds the same colsum -> corr == 8 * c^T c.
            diff = (acc_ref[...]
                    - corr_s * jnp.float32(inv_8ns)
                    + corr_t * jnp.float32(inv_8nt))
            part = jnp.sum(diff * diff, axis=1, keepdims=True)      # (d, 1)
            out_ref[...] = jnp.sum(part, axis=0, keepdims=True) * jnp.float32(scale)

    return kernel


def coral_loss(source, target, *, use_bf16_matmul=False,
               row_tile_source=None, row_tile_target=None):
    """source: (Ns, d), target: (Nt, d).  Returns scalar float32 CORAL loss."""
    ns, d = source.shape
    nt, dt = target.shape
    assert d == dt, "source and target must have the same feature dim"

    phys = _vmem_capacity_bytes()
    vmem_limit = min(phys - (8 << 20), 100 * 1024 * 1024)   # never request all VMEM
    vmem_limit = max(int(vmem_limit), 32 * 1024 * 1024)

    acc_bytes = d * d * 4
    misc_bytes = 2 * 8 * d * 4 + (1 << 20)
    avail_inputs = max(vmem_limit - acc_bytes - misc_bytes - (4 << 20), 2 << 20)
    # Two input streams, each double-buffered by the BlockSpec pipeline.
    per_tile_budget = min(avail_inputs // 4, 16 * 1024 * 1024)

    s_isz = jnp.dtype(source.dtype).itemsize
    t_isz = jnp.dtype(target.dtype).itemsize
    tn_s = (row_tile_source if row_tile_source is not None
            else _choose_row_tile(ns, d, s_isz, per_tile_budget))
    tn_t = (row_tile_target if row_tile_target is not None
            else _choose_row_tile(nt, d, t_isz, per_tile_budget))

    src_blocks = pl.cdiv(ns, tn_s)
    tgt_blocks = pl.cdiv(nt, tn_t)
    num_steps = max(src_blocks, tgt_blocks)

    kernel = _make_coral_kernel(ns, nt, d, tn_s, tn_t, use_bf16_matmul)

    out = pl.pallas_call(
        kernel,
        out_shape=jax.ShapeDtypeStruct((1, 1), jnp.float32),
        grid_spec=pltpu.PrefetchScalarGridSpec(
            num_scalar_prefetch=0,
            grid=(num_steps,),
            in_specs=[
                # Clamp trailing steps to the last valid block: the resident
                # block is re-used (no extra DMA) and compute is pl.when-skipped.
                pl.BlockSpec((tn_s, d),
                             lambda i: (jnp.minimum(i, src_blocks - 1), 0)),
                pl.BlockSpec((tn_t, d),
                             lambda i: (jnp.minimum(i, tgt_blocks - 1), 0)),
            ],
            out_specs=pl.BlockSpec((1, 1), lambda i: (0, 0)),
            scratch_shapes=[
                pltpu.VMEM((d, d), jnp.float32),   # resident diff-Gram accumulator
                pltpu.VMEM((8, d), jnp.float32),   # source column sums
                pltpu.VMEM((8, d), jnp.float32),   # target column sums
            ],
        ),
        compiler_params=pltpu.CompilerParams(
            dimension_semantics=("arbitrary",),
            vmem_limit_bytes=vmem_limit,
        ),
    )(source, target)
    return out[0, 0]


def _coral_ref(source, target):
    """Pure-JAX reference mirroring the PyTorch forward (highest precision)."""
    s = source.astype(jnp.float32)
    t = target.astype(jnp.float32)
    d = s.shape[1]
    hp = lax.Precision.HIGHEST
    xm = jnp.mean(s, axis=0, keepdims=True) - s
    xc = jnp.dot(xm.T, xm, precision=hp)
    xmt = jnp.mean(t, axis=0, keepdims=True) - t
    xct = jnp.dot(xmt.T, xmt, precision=hp)
    diff = xc - xct
    return jnp.mean(diff * diff) / (4.0 * d * d)


if __name__ == "__main__":
    key = jax.random.PRNGKey(0)
    k1, k2, k3, k4 = jax.random.split(key, 4)

    # Case 1: small shapes, ns != nt (8 source / 16 target samples, 32 features).
    src1 = jax.random.normal(k1, (8, 32), dtype=jnp.float32)
    tgt1 = jax.random.normal(k2, (16, 32), dtype=jnp.float32) * 1.3 + 0.5
    loss1 = jax.block_until_ready(jax.jit(coral_loss)(src1, tgt1))
    ref1 = jax.block_until_ready(_coral_ref(src1, tgt1))
    assert jnp.allclose(loss1, ref1, rtol=1e-4, atol=1e-7), (loss1, ref1)

    # Case 2: ns != nt with nonzero means and forced small row tiles so the
    # partial-tile mask, the clamped index_map, and the pl.when skip path are
    # all exercised (guards the 8-row colsum broadcast invariant as well).
    src2 = jax.random.normal(k3, (84, 128), dtype=jnp.float32) + 2.0
    tgt2 = jax.random.normal(k4, (160, 128), dtype=jnp.float32) * 0.7 - 1.5
    loss2 = jax.block_until_ready(
        jax.jit(lambda a, b: coral_loss(a, b, row_tile_source=32,
                                        row_tile_target=48))(src2, tgt2))
    ref2 = jax.block_until_ready(_coral_ref(src2, tgt2))
    assert jnp.allclose(loss2, ref2, rtol=5e-4, atol=1e-6), (loss2, ref2)

    print("KERNEL_OK")
</pallas_src>

<mosaic_0001>
module attributes {stable_mosaic.version = 11 : i64} {
  func.func @kernel(%arg0: i32, %arg1: memref<8x32xf32, #tpu.memory_space<vmem>>, %arg2: memref<16x32xf32, #tpu.memory_space<vmem>>, %arg3: memref<1x1xf32, #tpu.memory_space<vmem>>, %arg4: memref<32x32xf32, #tpu.memory_space<vmem>>, %arg5: memref<8x32xf32, #tpu.memory_space<vmem>>, %arg6: memref<8x32xf32, #tpu.memory_space<vmem>>) attributes {dimension_semantics = [#tpu.dimension_semantics<arbitrary>], iteration_bounds = array<i64: 1>, scalar_prefetch = 0 : i64, scratch_operands = 3 : i64, tpu.core_type = #tpu.core_type<tc>, window_params = [{transform_indices = @transform_0, window_bounds = array<i64: 8, 32>}, {transform_indices = @transform_1, window_bounds = array<i64: 16, 32>}, {pipeline_mode = #tpu.pipeline_mode<synchronous>, transform_indices = @transform_2, window_bounds = array<i64: 1, 1>}]} {
    %c0_i32 = arith.constant 0 : i32
    %0 = arith.cmpi eq, %arg0, %c0_i32 : i32
    %1 = arith.extui %0 : i1 to i32
    %c0_i32_0 = arith.constant 0 : i32
    %2 = arith.cmpi ne, %1, %c0_i32_0 : i32
    scf.if %2 {
      %cst = arith.constant 0.000000e+00 : f32
      %12 = vector.broadcast %cst : f32 to vector<32x32xf32>
      %c0 = arith.constant 0 : index
      %c0_6 = arith.constant 0 : index
      %13 = vector.load %arg4[%c0, %c0_6] : memref<32x32xf32, #tpu.memory_space<vmem>>, vector<32x32xf32>
      tpu.vector_store %arg4[%c0, %c0_6], %12 {strides = array<i32>} : memref<32x32xf32, #tpu.memory_space<vmem>>, vector<32x32xf32>,
      %cst_7 = arith.constant 0.000000e+00 : f32
      %14 = vector.broadcast %cst_7 : f32 to vector<8x32xf32>
      %c0_8 = arith.constant 0 : index
      %c0_9 = arith.constant 0 : index
      %15 = vector.load %arg5[%c0_8, %c0_9] : memref<8x32xf32, #tpu.memory_space<vmem>>, vector<8x32xf32>
      tpu.vector_store %arg5[%c0_8, %c0_9], %14 {strides = array<i32>} : memref<8x32xf32, #tpu.memory_space<vmem>>, vector<8x32xf32>,
      %cst_10 = arith.constant 0.000000e+00 : f32
      %16 = vector.broadcast %cst_10 : f32 to vector<8x32xf32>
      %c0_11 = arith.constant 0 : index
      %c0_12 = arith.constant 0 : index
      %17 = vector.load %arg6[%c0_11, %c0_12] : memref<8x32xf32, #tpu.memory_space<vmem>>, vector<8x32xf32>
      tpu.vector_store %arg6[%c0_11, %c0_12], %16 {strides = array<i32>} : memref<8x32xf32, #tpu.memory_space<vmem>>, vector<8x32xf32>,
      %cst_13 = arith.constant 0.000000e+00 : f32
      %18 = vector.broadcast %cst_13 : f32 to vector<1x1xf32>
      %c0_14 = arith.constant 0 : index
      %c0_15 = arith.constant 0 : index
      %19 = vector.load %arg3[%c0_14, %c0_15] : memref<1x1xf32, #tpu.memory_space<vmem>>, vector<1x1xf32>
      tpu.vector_store %arg3[%c0_14, %c0_15], %18 {strides = array<i32>} : memref<1x1xf32, #tpu.memory_space<vmem>>, vector<1x1xf32>,
    } else {
    }
    %c1_i32 = arith.constant 1 : i32
    %3 = arith.cmpi slt, %arg0, %c1_i32 : i32
    %4 = arith.extui %3 : i1 to i32
    %c0_i32_1 = arith.constant 0 : i32
    %5 = arith.cmpi ne, %4, %c0_i32_1 : i32
    scf.if %5 {
      %c0 = arith.constant 0 : index
      %c0_6 = arith.constant 0 : index
      %12 = vector.load %arg1[%c0, %c0_6] : memref<8x32xf32, #tpu.memory_space<vmem>>, vector<8x32xf32>
      %cst = arith.constant dense<0.000000e+00> : vector<32x32xf32>
      %13 = tpu.matmul %12, %12, %cst {dimension_numbers = #tpu.dot_dimension_numbers<[0], [0], [1], [1], [0, 1, 1, 1], [], []>} : vector<8x32xf32>, vector<8x32xf32>, vector<32x32xf32> -> vector<32x32xf32>
      %c0_7 = arith.constant 0 : index
      %c0_8 = arith.constant 0 : index
      %14 = vector.load %arg4[%c0_7, %c0_8] : memref<32x32xf32, #tpu.memory_space<vmem>>, vector<32x32xf32>
      %15 = arith.addf %14, %13 : vector<32x32xf32>
      %c0_9 = arith.constant 0 : index
      %c0_10 = arith.constant 0 : index
      %16 = vector.load %arg4[%c0_9, %c0_10] : memref<32x32xf32, #tpu.memory_space<vmem>>, vector<32x32xf32>
      tpu.vector_store %arg4[%c0_9, %c0_10], %15 {strides = array<i32>} : memref<32x32xf32, #tpu.memory_space<vmem>>, vector<32x32xf32>,
      %c0_11 = arith.constant 0 : index
      %c0_12 = arith.constant 0 : index
      %17 = vector.load %arg5[%c0_11, %c0_12] : memref<8x32xf32, #tpu.memory_space<vmem>>, vector<8x32xf32>
      %cst_13 = arith.constant dense<0.000000e+00> : vector<32xf32>
      %18 = vector.multi_reduction <add>, %12, %cst_13 [0] : vector<8x32xf32> to vector<32xf32>
      %19 = vector.shape_cast %18 : vector<32xf32> to vector<1x32xf32>
      %20 = vector.broadcast %19 : vector<1x32xf32> to vector<8x32xf32>
      %21 = arith.addf %17, %20 : vector<8x32xf32>
      %c0_14 = arith.constant 0 : index
      %c0_15 = arith.constant 0 : index
      %22 = vector.load %arg5[%c0_14, %c0_15] : memref<8x32xf32, #tpu.memory_space<vmem>>, vector<8x32xf32>
      tpu.vector_store %arg5[%c0_14, %c0_15], %21 {strides = array<i32>} : memref<8x32xf32, #tpu.memory_space<vmem>>, vector<8x32xf32>,
    } else {
    }
    %c1_i32_2 = arith.constant 1 : i32
    %6 = arith.cmpi slt, %arg0, %c1_i32_2 : i32
    %7 = arith.extui %6 : i1 to i32
    %c0_i32_3 = arith.constant 0 : i32
    %8 = arith.cmpi ne, %7, %c0_i32_3 : i32
    scf.if %8 {
      %c0 = arith.constant 0 : index
      %c0_6 = arith.constant 0 : index
      %12 = vector.load %arg2[%c0, %c0_6] : memref<16x32xf32, #tpu.memory_space<vmem>>, vector<16x32xf32>
      %cst = arith.constant dense<0.000000e+00> : vector<32x32xf32>
      %13 = tpu.matmul %12, %12, %cst {dimension_numbers = #tpu.dot_dimension_numbers<[0], [0], [1], [1], [0, 1, 1, 1], [], []>} : vector<16x32xf32>, vector<16x32xf32>, vector<32x32xf32> -> vector<32x32xf32>
      %c0_7 = arith.constant 0 : index
      %c0_8 = arith.constant 0 : index
      %14 = vector.load %arg4[%c0_7, %c0_8] : memref<32x32xf32, #tpu.memory_space<vmem>>, vector<32x32xf32>
      %15 = arith.subf %14, %13 : vector<32x32xf32>
      %c0_9 = arith.constant 0 : index
      %c0_10 = arith.constant 0 : index
      %16 = vector.load %arg4[%c0_9, %c0_10] : memref<32x32xf32, #tpu.memory_space<vmem>>, vector<32x32xf32>
      tpu.vector_store %arg4[%c0_9, %c0_10], %15 {strides = array<i32>} : memref<32x32xf32, #tpu.memory_space<vmem>>, vector<32x32xf32>,
      %c0_11 = arith.constant 0 : index
      %c0_12 = arith.constant 0 : index
      %17 = vector.load %arg6[%c0_11, %c0_12] : memref<8x32xf32, #tpu.memory_space<vmem>>, vector<8x32xf32>
      %cst_13 = arith.constant dense<0.000000e+00> : vector<32xf32>
      %18 = vector.multi_reduction <add>, %12, %cst_13 [0] : vector<16x32xf32> to vector<32xf32>
      %19 = vector.shape_cast %18 : vector<32xf32> to vector<1x32xf32>
      %20 = vector.broadcast %19 : vector<1x32xf32> to vector<8x32xf32>
      %21 = arith.addf %17, %20 : vector<8x32xf32>
      %c0_14 = arith.constant 0 : index
      %c0_15 = arith.constant 0 : index
      %22 = vector.load %arg6[%c0_14, %c0_15] : memref<8x32xf32, #tpu.memory_space<vmem>>, vector<8x32xf32>
      tpu.vector_store %arg6[%c0_14, %c0_15], %21 {strides = array<i32>} : memref<8x32xf32, #tpu.memory_space<vmem>>, vector<8x32xf32>,
    } else {
    }
    %c0_i32_4 = arith.constant 0 : i32
    %9 = arith.cmpi eq, %arg0, %c0_i32_4 : i32
    %10 = arith.extui %9 : i1 to i32
    %c0_i32_5 = arith.constant 0 : i32
    %11 = arith.cmpi ne, %10, %c0_i32_5 : i32
    scf.if %11 {
      %c0 = arith.constant 0 : index
      %c0_6 = arith.constant 0 : index
      %12 = vector.load %arg5[%c0, %c0_6] : memref<8x32xf32, #tpu.memory_space<vmem>>, vector<8x32xf32>
      %c0_7 = arith.constant 0 : index
      %c0_8 = arith.constant 0 : index
      %13 = vector.load %arg6[%c0_7, %c0_8] : memref<8x32xf32, #tpu.memory_space<vmem>>, vector<8x32xf32>
      %cst = arith.constant dense<0.000000e+00> : vector<32x32xf32>
      %14 = tpu.matmul %12, %12, %cst {dimension_numbers = #tpu.dot_dimension_numbers<[0], [0], [1], [1], [0, 1, 1, 1], [], []>} : vector<8x32xf32>, vector<8x32xf32>, vector<32x32xf32> -> vector<32x32xf32>
      %cst_9 = arith.constant dense<0.000000e+00> : vector<32x32xf32>
      %15 = tpu.matmul %13, %13, %cst_9 {dimension_numbers = #tpu.dot_dimension_numbers<[0], [0], [1], [1], [0, 1, 1, 1], [], []>} : vector<8x32xf32>, vector<8x32xf32>, vector<32x32xf32> -> vector<32x32xf32>
      %c0_10 = arith.constant 0 : index
      %c0_11 = arith.constant 0 : index
      %16 = vector.load %arg4[%c0_10, %c0_11] : memref<32x32xf32, #tpu.memory_space<vmem>>, vector<32x32xf32>
      %cst_12 = arith.constant 1.562500e-02 : f32
      %17 = vector.broadcast %cst_12 : f32 to vector<32x32xf32>
      %18 = arith.mulf %14, %17 : vector<32x32xf32>
      %19 = arith.subf %16, %18 : vector<32x32xf32>
      %cst_13 = arith.constant 7.812500e-03 : f32
      %20 = vector.broadcast %cst_13 : f32 to vector<32x32xf32>
      %21 = arith.mulf %15, %20 : vector<32x32xf32>
      %22 = arith.addf %19, %21 : vector<32x32xf32>
      %23 = arith.mulf %22, %22 : vector<32x32xf32>
      %cst_14 = arith.constant dense<0.000000e+00> : vector<32xf32>
      %24 = vector.multi_reduction <add>, %23, %cst_14 [1] : vector<32x32xf32> to vector<32xf32>
      %25 = vector.shape_cast %24 : vector<32xf32> to vector<32x1xf32>
      %cst_15 = arith.constant dense<0.000000e+00> : vector<1xf32>
      %26 = vector.multi_reduction <add>, %25, %cst_15 [0] : vector<32x1xf32> to vector<1xf32>
      %27 = vector.shape_cast %26 : vector<1xf32> to vector<1x1xf32>
      %cst_16 = arith.constant 2.38418579E-7 : f32
      %28 = vector.broadcast %cst_16 : f32 to vector<1x1xf32>
      %29 = arith.mulf %27, %28 : vector<1x1xf32>
      %c0_17 = arith.constant 0 : index
      %c0_18 = arith.constant 0 : index
      %30 = vector.load %arg3[%c0_17, %c0_18] : memref<1x1xf32, #tpu.memory_space<vmem>>, vector<1x1xf32>
      tpu.vector_store %arg3[%c0_17, %c0_18], %29 {strides = array<i32>} : memref<1x1xf32, #tpu.memory_space<vmem>>, vector<1x1xf32>,
    } else {
    }
    return
  }
  func.func @transform_0(%arg0: i32) -> (i32, i32) {
    %c0_i32 = arith.constant 0 : i32
    %0 = arith.minsi %arg0, %c0_i32 : i32
    %c0_i32_0 = arith.constant 0 : i32
    %c0_i32_1 = arith.constant 0 : i32
    return %0, %c0_i32_0 : i32, i32
  }
  func.func @transform_1(%arg0: i32) -> (i32, i32) {
    %c0_i32 = arith.constant 0 : i32
    %0 = arith.minsi %arg0, %c0_i32 : i32
    %c0_i32_0 = arith.constant 0 : i32
    %c0_i32_1 = arith.constant 0 : i32
    return %0, %c0_i32_0 : i32, i32
  }
  func.func @transform_2(%arg0: i32) -> (i32, i32) {
    %c0_i32 = arith.constant 0 : i32
    %c0_i32_0 = arith.constant 0 : i32
    %c0_i32_1 = arith.constant 0 : i32
    return %c0_i32, %c0_i32_0 : i32, i32
  }
}

</mosaic_0001>

<bundles_post_ra>
// kernel: coral_loss.1
= control target key start
LH: loop header
LB: loop body
LE: loop exit
PB: predicated region body
PF: predicated region fallthrough
CT: control target
= control target key end

     0   :  { %7 = vsyncpa [#allocation6], 0  ;;  %s911_s0 = inlined_call_operand.hbm [shape: f32[8,32], index: 0, kind: input, shape index: {}]   ;;  %s912_s1 = inlined_call_operand.hbm [shape: f32[16,32], index: 1, kind: input, shape index: {}]   ;;  %s913_s2 = inlined_call_operand.hbm [shape: f32[1,1], index: 2, kind: output, shape index: {}]  }
   0x1   :  { %8 = vsyncpa [#allocation9], 0 }
   0x2   :  { %9 = vsyncpa [#allocation7], 0  ;;  %s837_s9 = smov [#allocation5]   ;;  %s838_s11 = smov [#allocation8]  }
   0x3   :  { %s16_s10 = sshll.u32 %s837_s9, 4  ;;  %s25_s12 = sshll.u32 %s838_s11, 4  ;;  %s17_s10 = int_to_ptr.vmem [resolvable:$true] %s16_s10  ;;  %s26_s12 = int_to_ptr.vmem [resolvable:$true] %s25_s12 }
   0x4   :  { %s779_s13 = scalar_lea.vmem %s17_s10, 128  ;;  %p784_p1 = scmp.lt.s32.totalorder %s17_s10, %s17_s10 }
   0x5   :  { %p780_p0 = scmp.ne.s32.totalorder %s17_s10, %s779_s13  ;;  %p785_p2 = scmp.lt.s32.totalorder %s779_s13, %s779_s13 }
   0x7   :  { %p786_p3 = por %p785_p2, %p784_p1 }
   0x9   :  { %p787_p4 = pnand %p786_p3, %p780_p0 }
   0xb   :  { %790 = shalt.err (!%p787_p4)
}
   0xc   :  { %19 = dma.hbm_to_vmem [thread:$0]  %s911_s0, 128, %s17_s10, [#allocation6]  }
   0xd   :  { %s799_s16 = scalar_lea.vmem %s26_s12, 256  ;;  %p804_p6 = scmp.lt.s32.totalorder %s26_s12, %s26_s12 }
   0xe   :  { %p800_p5 = scmp.ne.s32.totalorder %s26_s12, %s799_s16  ;;  %p805_p7 = scmp.lt.s32.totalorder %s799_s16, %s799_s16 }
  0x10   :  { %p806_p8 = por %p805_p7, %p804_p6 }
  0x12   :  { %p807_p9 = pnand %p806_p8, %p800_p5 }
  0x14   :  { %810 = shalt.err (!%p807_p9)
}
  0x15   :  { %s839_s17 = smov 128   ;;  %s840_s18 = smov 8  }
  0x16   :  { %31 = dma.hbm_to_vmem [thread:$0]  %s912_s1, 256, %s26_s12, [#allocation9], %s839_s17, %s839_s17, %s840_s18  }
  0x17   :  { %831 = dma.done.wait [#allocation6], 128  }
  0x18   :  { %832 = vsyncadd [#allocation6], 4294967168 }
  0x19   :  { %833 = dma.done.wait [#allocation9], 256  }
  0x1a   :  { %834 = vsyncadd [#allocation9], 4294967040  ;;  %vm42_vm0 = vcmask 261120   ;;  %v841_v0 = vmov 0.0   ;;  %v55_v1 = vld [vmem:[#allocation5] sm:$0xff]  ;;  %v209_v2 = vld [vmem:[#allocation8] sm:$0xff] }
  0x1b   :  { %47 = vst.msk [vmem:[#allocation3] sm:$0xff] %vm42_vm0, %v841_v0  ;;  %43 = vst.msk [vmem:[#allocation2] sm:$0xff] %vm42_vm0, %v841_v0  ;;  %v210_v3 = vld [vmem:[#allocation8 + $0x8] sm:$0xff]  ;;  %56 = vxpose.xlu0.b32.start.end [1/1] (short) (narrow) %v55_v1, 32  ;;  %v200_v4 = vsel %vm42_vm0, %v55_v1, 0.0  ;;  %v354_v5 = vsel %vm42_vm0, %v209_v2, 0.0  ;;  %731 = vmatprep.subr.mxu0 %v55_v1 }
  0x1c   :  { %44 = vst.msk [vmem:[#allocation2 + $0x8] sm:$0xff] %vm42_vm0, %v841_v0  ;;  %45 = vst.msk [vmem:[#allocation2 + $0x10] sm:$0xff] %vm42_vm0, %v841_v0  ;;  %v355_v6 = vsel %vm42_vm0, %v210_v3, 0.0  ;;  %v201_v7 = vrot.slane %v200_v4, 4  ;;  %732 = vmatpush3.msra.mxu0 %v55_v1  ;;  %739 = vmatprep.subr.mxu1 %v210_v3  ;;  %vm88_vm1 = vcmask 64512   ;;  %vm243_vm2 = vcmask 130048  }
  0x1d   :  { %46 = vst.msk [vmem:[#allocation2 + $0x18] sm:$0xff] %vm42_vm0, %v841_v0  ;;  %48 = vst.msk [vmem:[#allocation4] sm:$0xff] %vm42_vm0, %v841_v0  ;;  %v356_v8 = vadd.f32 %v355_v6, %v354_v5  ;;  %740 = vmatpush3.msra.mxu1 %v210_v3  ;;  %vm49_vm3 = vcmask 0   ;;  %s842_s0 = smov [#allocation10]  }
  0x1e   :  { %v202_v9 = vadd.f32 %v201_v7, %v200_v4  ;;  %741 = vmatprep.subr.mxu1 %v209_v2  ;;  %50 = vst.msk [vmem:[#allocation10] sm:$0x1] %vm49_vm3, %v841_v0  ;;  %s684_s1 = sshll.u32 %s842_s0, 4  ;;  %s685_s1 = int_to_ptr.vmem [resolvable:$true] %s684_s1 }
  0x1f   :  { %v357_v10 = vrot.slane %v356_v8, 4  ;;  %742 = vmatpush3.msra.mxu1 %v209_v2  ;;  %s811_s21 = scalar_lea.vmem %s685_s1, 16  ;;  %s815_s22 = scalar_lea.vmem %s685_s1, 32 }
  0x20   :  { %v203_v11 = vrot.slane %v202_v9, 2  ;;  %p812_p10 = scmp.ne.s32.totalorder %s685_s1, %s811_s21  ;;  %p816_p11 = scmp.lt.s32.totalorder %s685_s1, %s685_s1 }
  0x21   :  { %v358_v12 = vadd.f32 %v357_v10, %v356_v8  ;;  %p817_p12 = scmp.lt.s32.totalorder %s815_s22, %s811_s21 }
  0x22   :  { %v204_v13 = vadd.f32 %v203_v11, %v202_v9  ;;  %v199_v17 = vld [vmem:[#allocation3] sm:$0xff] }
  0x23   :  { %v359_v14 = vrot.slane %v358_v12, 2  ;;  %v187_v42 = vld [vmem:[#allocation2 + $0x8] sm:$0xff]  ;;  %v186_v44 = vld [vmem:[#allocation2] sm:$0xff]  ;;  %v188_v50 = vld [vmem:[#allocation2 + $0x10] sm:$0xff]  ;;  %p818_p13 = por %p817_p12, %p816_p11 }
  0x24   :  { %v205_v15 = vrot.slane %v204_v13, 1  ;;  %v353_v20 = vld [vmem:[#allocation4] sm:$0xff]  ;;  %v189_v48 = vld [vmem:[#allocation2 + $0x18] sm:$0xff] }
  0x25   :  { %v360_v16 = vadd.f32 %v359_v14, %v358_v12  ;;  %p819_p0 = pnand %p818_p13, %p812_p10 }
  0x26   :  { %v206_v18 = vadd.f32 %v205_v15, %v204_v13 }
  0x27   :  { %v361_v19 = vrot.slane %v360_v16, 1 }
  0x28   :  { %v207_v21 = vadd.f32 %v206_v18, %v199_v17  ;;  %211 = vxpose.xlu0.b32.start [1/2] (short) (narrow) %v209_v2, 32 }
  0x29   :  { %v362_v22 = vadd.f32 %v361_v19, %v360_v16 }
  0x2a   :  { %208 = vst.msk [vmem:[#allocation3] sm:$0xff] %vm42_vm0, %v207_v21 }
  0x2b   :  { %v363_v23 = vadd.f32 %v362_v22, %v353_v20 }
  0x2c   :  { %212 = vxpose.xlu0.b32.end [2/2] (short) (narrow) %v210_v3, 32 }
  0x2d   :  { %364 = vst.msk [vmem:[#allocation4] sm:$0xff] %vm42_vm0, %v363_v23 }
  0x31   :  { %v368_v24 = vld [vmem:[#allocation3] sm:$0xff] }
  0x32   :  { %370 = vxpose.xlu1.b32.start.end [1/1] (short) (narrow) %v368_v24, 32  ;;  %749 = vmatprep.subr.mxu0 %v368_v24 }
  0x34   :  { %v369_v25 = vld [vmem:[#allocation4] sm:$0xff] }
  0x35   :  { %757 = vmatprep.subr.mxu1 %v369_v25 }
  0x3f   :  { %500 = vxpose.xlu1.b32.start.end [1/1] (short) (narrow) %v369_v25, 32 }
  0x97   :  { %v72_v26 = vpop.trf.xlu0 }
  0x98   :  { %733 = vmatprep.mubr.msk.f32.mxu0 %vm88_vm1, %v72_v26 }
  0x9b   :  { %v73_v27 = vpop.trf.xlu0 }
  0x9c   :  { %734 = vmatmul.mubr.msk.f32.vlgmr.msra.gmra.mxu0 %vm88_vm1, %v73_v27 }
  0x9d   :  { %750 = vmatpush3.msra.mxu0 %v368_v24 }
  0x9f   :  { %v74_v28 = vpop.trf.xlu0 }
  0xa0   :  { %736 = vmatprep.mubr.msk.f32.mxu0 %vm88_vm1, %v74_v28 }
  0xa3   :  { %v75_v29 = vpop.trf.xlu0 }
  0xa4   :  { %737 = vmatmul.mubr.msk.f32.gmra.mxu0 %vm88_vm1, %v75_v29 }
  0xa7   :  { %v227_v30 = vpop.trf.xlu0 }
  0xa8   :  { %743 = vmatprep.mubr.msk.f32.mxu1 %vm243_vm2, %v227_v30 }
  0xab   :  { %v228_v31 = vpop.trf.xlu0 }
  0xac   :  { %744 = vmatmul.mubr.msk.f32.vlgmr.msra.gmra.mxu1 %vm243_vm2, %v228_v31 }
  0xad   :  { %758 = vmatpush3.msra.mxu1 %v369_v25 }
  0xae   :  { %v386_v32 = vpop.trf.xlu1 }
  0xaf   :  { %v229_v33 = vpop.trf.xlu0  ;;  %751 = vmatprep.mubr.msk.f32.mxu0 %vm88_vm1, %v386_v32 }
  0xb0   :  { %746 = vmatprep.mubr.msk.f32.mxu1 %vm243_vm2, %v229_v33 }
  0xb2   :  { %v387_v34 = vpop.trf.xlu1 }
  0xb3   :  { %v230_v35 = vpop.trf.xlu0  ;;  %752 = vmatmul.mubr.msk.f32.vlgmr.msra.gmra.mxu0 %vm88_vm1, %v387_v34 }
  0xb4   :  { %747 = vmatmul.mubr.msk.f32.gmra.mxu1 %vm243_vm2, %v230_v35 }
  0xb6   :  { %v388_v36 = vpop.trf.xlu1 }
  0xb7   :  { %754 = vmatprep.mubr.msk.f32.mxu0 %vm88_vm1, %v388_v36 }
  0xba   :  { %v389_v37 = vpop.trf.xlu1 }
  0xbb   :  { %755 = vmatmul.mubr.msk.f32.gmra.mxu0 %vm88_vm1, %v389_v37 }
  0xbe   :  { %v516_v38 = vpop.trf.xlu1 }
  0xbf   :  { %759 = vmatprep.mubr.msk.f32.mxu1 %vm88_vm1, %v516_v38 }
  0xc2   :  { %v517_v39 = vpop.trf.xlu1 }
  0xc3   :  { %760 = vmatmul.mubr.msk.f32.vlgmr.msra.gmra.mxu1 %vm88_vm1, %v517_v39 }
  0xc6   :  { %v518_v40 = vpop.trf.xlu1 }
  0xc7   :  { %762 = vmatprep.mubr.msk.f32.mxu1 %vm88_vm1, %v518_v40 }
  0xca   :  { %v519_v41 = vpop.trf.xlu1 }
  0xcb   :  { %763 = vmatmul.mubr.msk.f32.gmra.mxu1 %vm88_vm1, %v519_v41 }
 0x15c   :  { %v735_v43 = vpop.f32.mrf.mxu0 }
 0x15d   :  { %v191_v45 = vadd.f32 %v735_v43, %v187_v42 }
 0x15e   :  { %v167_v46 = vpop.f32.mrf.mxu0 }
 0x15f   :  { %196 = vst.msk [vmem:[#allocation2 + $0x8] sm:$0xff] %vm42_vm0, %v191_v45  ;;  %v190_v47 = vadd.f32 %v186_v44, %v167_v46 }
 0x161   :  { %195 = vst.msk [vmem:[#allocation2] sm:$0xff] %vm42_vm0, %v190_v47 }
 0x164   :  { %v738_v49 = vpop.f32.mrf.mxu0 }
 0x165   :  { %v193_v51 = vadd.f32 %v738_v49, %v189_v48 }
 0x166   :  { %v177_v52 = vpop.f32.mrf.mxu0  ;;  %v342_v54 = vld [vmem:[#allocation2 + $0x8] sm:$0xff] }
 0x167   :  { %198 = vst.msk [vmem:[#allocation2 + $0x18] sm:$0xff] %vm42_vm0, %v193_v51  ;;  %v192_v53 = vadd.f32 %v188_v50, %v177_v52 }
 0x168   :  { %v341_v56 = vld [vmem:[#allocation2] sm:$0xff] }
 0x169   :  { %197 = vst.msk [vmem:[#allocation2 + $0x10] sm:$0xff] %vm42_vm0, %v192_v53 }
 0x16c   :  { %v745_v55 = vpop.f32.mrf.mxu1 }
 0x16d   :  { %v346_v57 = vsub.f32 %v342_v54, %v745_v55 }
 0x16e   :  { %v322_v58 = vpop.f32.mrf.mxu1  ;;  %v344_v60 = vld [vmem:[#allocation2 + $0x18] sm:$0xff] }
 0x16f   :  { %350 = vst.msk [vmem:[#allocation2 + $0x8] sm:$0xff] %vm42_vm0, %v346_v57  ;;  %v345_v59 = vsub.f32 %v341_v56, %v322_v58 }
 0x170   :  { %v343_v62 = vld [vmem:[#allocation2 + $0x10] sm:$0xff] }
 0x171   :  { %349 = vst.msk [vmem:[#allocation2] sm:$0xff] %vm42_vm0, %v345_v59 }
 0x173   :  { %v753_v3 = vpop.f32.mrf.mxu0 }
 0x174   :  { %v748_v61 = vpop.f32.mrf.mxu1  ;;  %v634_v5 = vmul.f32 0.015625, %v753_v3 }
 0x175   :  { %v348_v63 = vsub.f32 %v344_v60, %v748_v61  ;;  %v481_v4 = vpop.f32.mrf.mxu0 }
 0x176   :  { %v332_v1 = vpop.f32.mrf.mxu1  ;;  %v630_v6 = vld [vmem:[#allocation2 + $0x8] sm:$0xff]  ;;  %v633_v7 = vmul.f32 0.015625, %v481_v4 }
 0x177   :  { %352 = vst.msk [vmem:[#allocation2 + $0x18] sm:$0xff] %vm42_vm0, %v348_v63  ;;  %v347_v2 = vsub.f32 %v343_v62, %v332_v1  ;;  %v638_v11 = vsub.f32 %v630_v6, %v634_v5 }
 0x178   :  { %v629_v8 = vld [vmem:[#allocation2] sm:$0xff] }
 0x179   :  { %351 = vst.msk [vmem:[#allocation2 + $0x10] sm:$0xff] %vm42_vm0, %v347_v2  ;;  %v637_v14 = vsub.f32 %v629_v8, %v633_v7 }
 0x17b   :  { %v756_v9 = vpop.f32.mrf.mxu0 }
 0x17c   :  { %v636_v20 = vmul.f32 0.015625, %v756_v9 }
 0x17d   :  { %v491_v17 = vpop.f32.mrf.mxu0 }
 0x17e   :  { %v635_v21 = vmul.f32 0.015625, %v491_v17  ;;  %v632_v24 = vld [vmem:[#allocation2 + $0x18] sm:$0xff] }
 0x17f   :  { %v640_v30 = vsub.f32 %v632_v24, %v636_v20 }
 0x180   :  { %v631_v25 = vld [vmem:[#allocation2 + $0x10] sm:$0xff] }
 0x181   :  { %v639_v31 = vsub.f32 %v631_v25, %v635_v21 }
 0x183   :  { %v761_v10 = vpop.f32.mrf.mxu1 }
 0x184   :  { %v642_v12 = vmul.f32 0.0078125, %v761_v10 }
 0x185   :  { %v610_v13 = vpop.f32.mrf.mxu1 }
 0x186   :  { %v646_v15 = vadd.f32 %v642_v12, %v638_v11  ;;  %v641_v16 = vmul.f32 0.0078125, %v610_v13 }
 0x188   :  { %v645_v18 = vadd.f32 %v641_v16, %v637_v14  ;;  %v650_v19 = vmul.f32 %v646_v15, %v646_v15 }
 0x18a   :  { %v657_v22 = vsel %vm42_vm0, %v650_v19, 0.0  ;;  %v649_v23 = vmul.f32 %v645_v18, %v645_v18 }
 0x18b   :  { %v764_v26 = vpop.f32.mrf.mxu1  ;;  %658 = vadd.xlane.f32.xlu0 %v657_v22 }
 0x18c   :  { %v644_v27 = vmul.f32 0.0078125, %v764_v26  ;;  %v654_v28 = vsel %vm42_vm0, %v649_v23, 0.0 }
 0x18d   :  { %v620_v29 = vpop.f32.mrf.mxu1  ;;  %655 = vadd.xlane.f32.xlu1 %v654_v28 }
 0x18e   :  { %v643_v32 = vmul.f32 0.0078125, %v620_v29  ;;  %v648_v33 = vadd.f32 %v644_v27, %v640_v30 }
 0x190   :  { %v647_v34 = vadd.f32 %v643_v32, %v639_v31  ;;  %v652_v37 = vmul.f32 %v648_v33, %v648_v33 }
 0x192   :  { %v651_v35 = vmul.f32 %v647_v34, %v647_v34  ;;  %v663_v38 = vsel %vm42_vm0, %v652_v37, 0.0 }
 0x194   :  { %v660_v36 = vsel %vm42_vm0, %v651_v35, 0.0 }
 0x195   :  { %661 = vadd.xlane.f32.xlu1 %v660_v36 }
 0x199   :  { %664 = vadd.xlane.f32.xlu1 %v663_v38 }
 0x214   :  { %v659_v40 = vpop.xlane.xlu0 %658 }
 0x216   :  { %v656_v39 = vpop.xlane.xlu1 %655 }
 0x217   :  { %v666_v42 = vadd.f32 %v659_v40, %v656_v39 }
 0x21e   :  { %v662_v41 = vpop.xlane.xlu1 %661 }
 0x21f   :  { %v667_v43 = vadd.f32 %v666_v42, %v662_v41 }
 0x222   :  { %v665_v44 = vpop.xlane.xlu1 %664 }
 0x223   :  { %v668_v45 = vadd.f32 %v667_v43, %v665_v44 }
 0x225   :  { %v669_v46 = vrot.slane %v668_v45, 4 }
 0x227   :  { %v670_v47 = vadd.f32 %v669_v46, %v668_v45 }
 0x229   :  { %v671_v48 = vrot.slane %v670_v47, 2 }
 0x22b   :  { %v672_v49 = vadd.f32 %v671_v48, %v670_v47 }
 0x22d   :  { %v673_v50 = vrot.slane %v672_v49, 1 }
 0x22f   :  { %v674_v51 = vadd.f32 %v673_v50, %v672_v49 }
 0x231   :  { %v675_v52 = vmul.f32 2.3841858e-07, %v674_v51 }
 0x233   :  { %677 = vst.msk [vmem:[#allocation10] sm:$0x1] %vm49_vm3, %v675_v52 }
 0x234   :  { %822 = shalt.err (!%p819_p0)
}
 0x235   :  { %687 = dma.vmem_to_hbm [thread:$0]  %s685_s1, 16, %s913_s2, [#allocation7]  }
 0x236   :  { %835 = dma.done.wait [#allocation7], 16  }
 0x237   :  { %836 = vsyncadd [#allocation7], 4294967280 }
 0x238   :  { %691 = vsyncpa [#allocation6], 1 }
 0x239   :  { %692 = vsyncpa [#allocation9], 1 }
 0x23a   :  { %693 = vsyncpa [#allocation7], 1 }

</bundles_post_ra>
